<compile_context>
chip_gen: v6e
topology: v6e:2x2x1
jax: 0.10.0
libtpu: 0.0.40
codegen_flags: <defaults>
</compile_context>

<pallas_src>
import functools
import math

import jax
import jax.numpy as jnp
from jax import lax
from jax.experimental import pallas as pl
from jax.experimental.pallas import tpu as pltpu


def _sigmoid(z):
    # tanh-based sigmoid: transcendental goes to the EUP slot, no f32 divide.
    return 0.5 * jnp.tanh(0.5 * z) + 0.5


def _lstm_model_kernel(
    x_ref,                        # [TILE_T, TILE_B, nx]   f32
    w_in_ref, b_in_ref,           # [nx, H] bf16, [1, H] f32
    w_ih_ref, w_hh_ref, b_g_ref,  # [H, 4H] bf16, [H, 4H] bf16, [1, 4H] f32
    w_out_ref, b_out_ref,         # [H, ny] bf16, [1, ny] f32
    o_ref,                        # [TILE_T, TILE_B, ny]   f32
    h_carry, c_carry,             # VMEM [TILE_B, H] f32   (carried across chunks)
    gx_scr,                       # VMEM [TILE_T, TILE_B, 4H] f32
    h_chunk,                      # VMEM [TILE_T, TILE_B, H]  f32
):
    tc = pl.program_id(1)

    @pl.when(tc == 0)
    def _():
        h_carry[...] = jnp.zeros_like(h_carry)
        c_carry[...] = jnp.zeros_like(c_carry)

    tile_t, tile_b, nx = x_ref.shape
    H = h_carry.shape[-1]
    bf16 = jnp.bfloat16

    # Hoisted weight / bias loads (JAX does not CSE broadcasts inside loops).
    w_hh = w_hh_ref[...]
    b_g = b_g_ref[...]

    # ---- Batched over the whole time chunk: linearIn + ReLU + x-part of gates.
    x_flat = x_ref[...].reshape(tile_t * tile_b, nx).astype(bf16)
    x0 = jnp.dot(x_flat, w_in_ref[...],
                 preferred_element_type=jnp.float32) + b_in_ref[...]
    x0 = jnp.maximum(x0, 0.0)
    gx = jnp.dot(x0.astype(bf16), w_ih_ref[...],
                 preferred_element_type=jnp.float32) + b_g
    gx_scr[...] = gx.reshape(tile_t, tile_b, 4 * H)

    # ---- Sequential recurrence over the chunk (h/c in f32).
    def step(t, carry):
        h, c = carry
        gates = gx_scr[t] + jnp.dot(h.astype(bf16), w_hh,
                                    preferred_element_type=jnp.float32)
        i_g = _sigmoid(gates[:, 0 * H:1 * H])
        f_g = _sigmoid(gates[:, 1 * H:2 * H])
        g_g = jnp.tanh(gates[:, 2 * H:3 * H])
        o_g = _sigmoid(gates[:, 3 * H:4 * H])
        c = f_g * c + i_g * g_g
        h = o_g * jnp.tanh(c)
        h_chunk[t] = h
        return (h, c)

    h, c = lax.fori_loop(0, tile_t, step, (h_carry[...], c_carry[...]))
    h_carry[...] = h
    c_carry[...] = c

    # ---- Batched linearOut over the whole chunk + one block store.
    hs = h_chunk[...].reshape(tile_t * tile_b, H).astype(bf16)
    out = jnp.dot(hs, w_out_ref[...],
                  preferred_element_type=jnp.float32) + b_out_ref[...]
    o_ref[...] = out.reshape(tile_t, tile_b, -1).astype(o_ref.dtype)


def _pick_tile_b(B):
    """Largest batch tile (multiple of 8, <= 512) dividing B, preferring >= 2
    batch tiles so both v7x TensorCores get work; else whole B."""
    if B % 8 != 0:
        return B
    divisors = [c for c in (512, 256, 128, 64, 32, 16, 8) if B % c == 0]
    for c in divisors:
        if B // c >= 2:
            return c
    return divisors[0] if divisors else B


def _pick_tiles(T, B, nx, H, ny):
    tile_b = _pick_tile_b(B)
    tile_t = min(T, 32)

    # Keep per-grid-step VMEM scratch within a conservative budget so the
    # kernel stays resident even on v7x (64 MiB physical VMEM).
    def scratch_bytes(tt):
        return 4 * (2 * tile_b * H          # h/c carry
                    + tt * tile_b * 4 * H   # gate pre-activations
                    + tt * tile_b * H       # h history for batched linearOut
                    + 2 * tt * tile_b * nx  # double-buffered x block
                    + 2 * tt * tile_b * ny)  # double-buffered out block

    budget = 24 * 1024 * 1024
    while tile_t > 1 and scratch_bytes(tile_t) > budget:
        tile_t //= 2
    return tile_b, tile_t


@functools.partial(jax.jit, static_argnames=("tile_b", "tile_t"))
def lstm_model_forward(x, params, tile_b=None, tile_t=None):
    """x: [T, B, nx] float32; params: dict (see init_params). Returns [T, B, ny]."""
    T, B, nx = x.shape
    H = params["w_hh"].shape[0]
    ny = params["w_out"].shape[1]

    auto_b, auto_t = _pick_tiles(T, B, nx, H, ny)
    if tile_b is None:
        tile_b = auto_b
    if tile_t is None:
        tile_t = auto_t
    assert B % tile_b == 0, (B, tile_b)
    nb = B // tile_b

    # Pad the time axis up to a multiple of tile_t (extra steps only run after
    # the real sequence, so the first T outputs are unaffected).
    Tp = ((T + tile_t - 1) // tile_t) * tile_t
    if Tp != T:
        x = jnp.pad(x, ((0, Tp - T), (0, 0), (0, 0)))
    nt = Tp // tile_t

    const2 = lambda b, t: (0, 0)
    in_specs = [
        pl.BlockSpec((tile_t, tile_b, nx), lambda b, t: (t, b, 0)),  # x chunk
        pl.BlockSpec((nx, H), const2),                               # weights stay VMEM-resident
        pl.BlockSpec((1, H), const2),
        pl.BlockSpec((H, 4 * H), const2),
        pl.BlockSpec((H, 4 * H), const2),
        pl.BlockSpec((1, 4 * H), const2),
        pl.BlockSpec((H, ny), const2),
        pl.BlockSpec((1, ny), const2),
    ]
    out_specs = pl.BlockSpec((tile_t, tile_b, ny), lambda b, t: (t, b, 0))

    # Advisory cost estimate for XLA's scheduler.
    flops = 2 * T * B * (nx * H + 2 * (4 * H * H) + H * ny) + 10 * T * B * H
    transcendentals = 5 * T * B * H
    param_bytes = sum(int(v.size) * v.dtype.itemsize for v in params.values())
    bytes_accessed = int(x.size) * x.dtype.itemsize + T * B * ny * 4 + param_bytes

    out = pl.pallas_call(
        _lstm_model_kernel,
        out_shape=jax.ShapeDtypeStruct((Tp, B, ny), jnp.float32),
        grid_spec=pltpu.PrefetchScalarGridSpec(
            num_scalar_prefetch=0,
            grid=(nb, nt),
            in_specs=in_specs,
            out_specs=out_specs,
            scratch_shapes=[
                pltpu.VMEM((tile_b, H), jnp.float32),                 # h carry
                pltpu.VMEM((tile_b, H), jnp.float32),                 # c carry
                pltpu.VMEM((tile_t, tile_b, 4 * H), jnp.float32),     # gate pre-acts
                pltpu.VMEM((tile_t, tile_b, H), jnp.float32),         # h history
            ],
        ),
        compiler_params=pltpu.CompilerParams(
            # batch tiles are independent -> parallel (2 TCs on v7x);
            # time chunks carry h/c through scratch -> arbitrary (sequential).
            dimension_semantics=("parallel", "arbitrary"),
            vmem_limit_bytes=64 * 1024 * 1024,
        ),
        cost_estimate=pl.CostEstimate(
            flops=int(flops),
            transcendentals=int(transcendentals),
            bytes_accessed=int(bytes_accessed),
        ),
    )(
        x,
        params["w_in"], params["b_in"],
        params["w_ih"], params["w_hh"], params["b_g"],
        params["w_out"], params["b_out"],
    )
    return out[:T]


def init_params(key, nx, hidden_size, ny):
    """Deterministic init mirroring CudnnLstmModel.__init__ (uniform(-stdv, stdv)).
    Weight matrices are stored [in, out] (transposed from PyTorch) and in bf16
    so every matmul is a plain bf16 x @ W on the MXU with f32 accumulation.
    The two cuDNN gate biases are folded into one (b_g = b_ih + b_hh)."""
    H = hidden_size
    k = jax.random.split(key, 8)
    stdv_in = 1.0 / math.sqrt(nx)
    stdv_h = 1.0 / math.sqrt(H)

    def u(kk, shape, s, dtype=jnp.float32):
        return jax.random.uniform(kk, shape, jnp.float32, -s, s).astype(dtype)

    b_ih = u(k[4], (1, 4 * H), stdv_h)
    b_hh = u(k[5], (1, 4 * H), stdv_h)
    return {
        "w_in": u(k[0], (nx, H), stdv_in, jnp.bfloat16),
        "b_in": u(k[1], (1, H), stdv_in),
        "w_ih": u(k[2], (H, 4 * H), stdv_h, jnp.bfloat16),
        "w_hh": u(k[3], (H, 4 * H), stdv_h, jnp.bfloat16),
        "b_g": b_ih + b_hh,
        "w_out": u(k[6], (H, ny), stdv_h, jnp.bfloat16),
        "b_out": u(k[7], (1, ny), stdv_h),
    }


def reference_forward(x, params):
    """Pure-JAX reference of the same eval-mode forward (bf16 matmul inputs,
    f32 accumulation — matches the kernel's numerics) for verification."""
    T, B, _ = x.shape
    H = params["w_hh"].shape[0]
    bf16 = jnp.bfloat16

    x0 = jnp.maximum(
        jnp.einsum("tbi,ih->tbh", x.astype(bf16), params["w_in"],
                   preferred_element_type=jnp.float32) + params["b_in"], 0.0)

    def step(carry, xt):
        h, c = carry
        gates = (jnp.dot(xt.astype(bf16), params["w_ih"],
                         preferred_element_type=jnp.float32)
                 + jnp.dot(h.astype(bf16), params["w_hh"],
                           preferred_element_type=jnp.float32)
                 + params["b_g"])
        i_g = _sigmoid(gates[:, 0 * H:1 * H])
        f_g = _sigmoid(gates[:, 1 * H:2 * H])
        g_g = jnp.tanh(gates[:, 2 * H:3 * H])
        o_g = _sigmoid(gates[:, 3 * H:4 * H])
        c = f_g * c + i_g * g_g
        h = o_g * jnp.tanh(c)
        return (h, c), h

    h0 = jnp.zeros((B, H), jnp.float32)
    c0 = jnp.zeros((B, H), jnp.float32)
    (_, _), hs = lax.scan(step, (h0, c0), x0)
    return (jnp.einsum("tbh,ho->tbo", hs.astype(bf16), params["w_out"],
                       preferred_element_type=jnp.float32) + params["b_out"])


if __name__ == "__main__":
    T, B, nx, hidden, ny = 8, 8, 16, 32, 1

    key = jax.random.PRNGKey(0)
    kx, kp = jax.random.split(key)
    x = jax.random.normal(kx, (T, B, nx), jnp.float32)
    params = init_params(kp, nx, hidden, ny)

    out = lstm_model_forward(x, params)
    out = jax.block_until_ready(out)

    ref = reference_forward(x, params)
    assert out.shape == (T, B, ny), out.shape
    assert jnp.allclose(out, ref, atol=2e-3, rtol=2e-3), (out, ref)
    print("KERNEL_OK")
</pallas_src>

<mosaic_0001>
module attributes {stable_mosaic.version = 11 : i64} {
  func.func @_lstm_model_kernel(%arg0: i32, %arg1: i32, %arg2: memref<8x8x16xf32, #tpu.memory_space<vmem>>, %arg3: memref<16x32xbf16, #tpu.memory_space<vmem>>, %arg4: memref<1x32xf32, #tpu.memory_space<vmem>>, %arg5: memref<32x128xbf16, #tpu.memory_space<vmem>>, %arg6: memref<32x128xbf16, #tpu.memory_space<vmem>>, %arg7: memref<1x128xf32, #tpu.memory_space<vmem>>, %arg8: memref<32x1xbf16, #tpu.memory_space<vmem>>, %arg9: memref<1x1xf32, #tpu.memory_space<vmem>>, %arg10: memref<8x8x1xf32, #tpu.memory_space<vmem>>, %arg11: memref<8x32xf32, #tpu.memory_space<vmem>>, %arg12: memref<8x32xf32, #tpu.memory_space<vmem>>, %arg13: memref<8x8x128xf32, #tpu.memory_space<vmem>>, %arg14: memref<8x8x32xf32, #tpu.memory_space<vmem>>) attributes {dimension_semantics = [#tpu.dimension_semantics<parallel>, #tpu.dimension_semantics<arbitrary>], iteration_bounds = array<i64: 1, 1>, scalar_prefetch = 0 : i64, scratch_operands = 4 : i64, tpu.core_type = #tpu.core_type<tc>, window_params = [{transform_indices = @transform_0, window_bounds = array<i64: 8, 8, 16>}, {pipeline_mode = #tpu.pipeline_mode<synchronous>, transform_indices = @transform_1, window_bounds = array<i64: 16, 32>}, {pipeline_mode = #tpu.pipeline_mode<synchronous>, transform_indices = @transform_2, window_bounds = array<i64: 1, 32>}, {pipeline_mode = #tpu.pipeline_mode<synchronous>, transform_indices = @transform_3, window_bounds = array<i64: 32, 128>}, {pipeline_mode = #tpu.pipeline_mode<synchronous>, transform_indices = @transform_4, window_bounds = array<i64: 32, 128>}, {pipeline_mode = #tpu.pipeline_mode<synchronous>, transform_indices = @transform_5, window_bounds = array<i64: 1, 128>}, {pipeline_mode = #tpu.pipeline_mode<synchronous>, transform_indices = @transform_6, window_bounds = array<i64: 32, 1>}, {pipeline_mode = #tpu.pipeline_mode<synchronous>, transform_indices = @transform_7, window_bounds = array<i64: 1, 1>}, {transform_indices = @transform_8, window_bounds = array<i64: 8, 8, 1>}]} {
    %c0_i32 = arith.constant 0 : i32
    %0 = arith.cmpi eq, %arg1, %c0_i32 : i32
    %1 = arith.extui %0 : i1 to i32
    %c0_i32_0 = arith.constant 0 : i32
    %2 = arith.cmpi ne, %1, %c0_i32_0 : i32
    scf.if %2 {
      %cst_39 = arith.constant 0.000000e+00 : f32
      %38 = vector.broadcast %cst_39 : f32 to vector<8x32xf32>
      %c0_40 = arith.constant 0 : index
      %c0_41 = arith.constant 0 : index
      %39 = vector.load %arg11[%c0_40, %c0_41] : memref<8x32xf32, #tpu.memory_space<vmem>>, vector<8x32xf32>
      tpu.vector_store %arg11[%c0_40, %c0_41], %38 {strides = array<i32>} : memref<8x32xf32, #tpu.memory_space<vmem>>, vector<8x32xf32>,
      %cst_42 = arith.constant 0.000000e+00 : f32
      %40 = vector.broadcast %cst_42 : f32 to vector<8x32xf32>
      %c0_43 = arith.constant 0 : index
      %c0_44 = arith.constant 0 : index
      %41 = vector.load %arg12[%c0_43, %c0_44] : memref<8x32xf32, #tpu.memory_space<vmem>>, vector<8x32xf32>
      tpu.vector_store %arg12[%c0_43, %c0_44], %40 {strides = array<i32>} : memref<8x32xf32, #tpu.memory_space<vmem>>, vector<8x32xf32>,
    } else {
    }
    %c0 = arith.constant 0 : index
    %c0_1 = arith.constant 0 : index
    %3 = vector.load %arg6[%c0, %c0_1] : memref<32x128xbf16, #tpu.memory_space<vmem>>, vector<32x128xbf16>
    %c0_2 = arith.constant 0 : index
    %c0_3 = arith.constant 0 : index
    %4 = vector.load %arg7[%c0_2, %c0_3] : memref<1x128xf32, #tpu.memory_space<vmem>>, vector<1x128xf32>
    %c0_4 = arith.constant 0 : index
    %c0_5 = arith.constant 0 : index
    %c0_6 = arith.constant 0 : index
    %5 = vector.load %arg2[%c0_4, %c0_5, %c0_6] : memref<8x8x16xf32, #tpu.memory_space<vmem>>, vector<8x8x16xf32>
    %6 = vector.shape_cast %5 : vector<8x8x16xf32> to vector<64x16xf32>
    %7 = arith.truncf %6 : vector<64x16xf32> to vector<64x16xbf16>
    %c0_7 = arith.constant 0 : index
    %c0_8 = arith.constant 0 : index
    %8 = vector.load %arg3[%c0_7, %c0_8] : memref<16x32xbf16, #tpu.memory_space<vmem>>, vector<16x32xbf16>
    %cst = arith.constant dense<0.000000e+00> : vector<64x32xf32>
    %9 = tpu.matmul %7, %8, %cst {dimension_numbers = #tpu.dot_dimension_numbers<[1], [0], [0], [1], [0, 0, 1, 1], [], []>} : vector<64x16xbf16>, vector<16x32xbf16>, vector<64x32xf32> -> vector<64x32xf32>
    %c0_9 = arith.constant 0 : index
    %c0_10 = arith.constant 0 : index
    %10 = vector.load %arg4[%c0_9, %c0_10] : memref<1x32xf32, #tpu.memory_space<vmem>>, vector<1x32xf32>
    %11 = vector.broadcast %10 : vector<1x32xf32> to vector<64x32xf32>
    %12 = arith.addf %9, %11 : vector<64x32xf32>
    %cst_11 = arith.constant 0.000000e+00 : f32
    %13 = vector.broadcast %cst_11 : f32 to vector<64x32xf32>
    %14 = arith.maximumf %12, %13 : vector<64x32xf32>
    %15 = arith.truncf %14 : vector<64x32xf32> to vector<64x32xbf16>
    %c0_12 = arith.constant 0 : index
    %c0_13 = arith.constant 0 : index
    %16 = vector.load %arg5[%c0_12, %c0_13] : memref<32x128xbf16, #tpu.memory_space<vmem>>, vector<32x128xbf16>
    %cst_14 = arith.constant dense<0.000000e+00> : vector<64x128xf32>
    %17 = tpu.matmul %15, %16, %cst_14 {dimension_numbers = #tpu.dot_dimension_numbers<[1], [0], [0], [1], [0, 0, 1, 1], [], []>} : vector<64x32xbf16>, vector<32x128xbf16>, vector<64x128xf32> -> vector<64x128xf32>
    %18 = vector.broadcast %4 : vector<1x128xf32> to vector<64x128xf32>
    %19 = arith.addf %17, %18 : vector<64x128xf32>
    %20 = vector.shape_cast %19 : vector<64x128xf32> to vector<8x8x128xf32>
    %c0_15 = arith.constant 0 : index
    %c0_16 = arith.constant 0 : index
    %c0_17 = arith.constant 0 : index
    %21 = vector.load %arg13[%c0_15, %c0_16, %c0_17] : memref<8x8x128xf32, #tpu.memory_space<vmem>>, vector<8x8x128xf32>
    tpu.vector_store %arg13[%c0_15, %c0_16, %c0_17], %20 {strides = array<i32>} : memref<8x8x128xf32, #tpu.memory_space<vmem>>, vector<8x8x128xf32>,
    %c0_18 = arith.constant 0 : index
    %c0_19 = arith.constant 0 : index
    %22 = vector.load %arg11[%c0_18, %c0_19] : memref<8x32xf32, #tpu.memory_space<vmem>>, vector<8x32xf32>
    %c0_20 = arith.constant 0 : index
    %c0_21 = arith.constant 0 : index
    %23 = vector.load %arg12[%c0_20, %c0_21] : memref<8x32xf32, #tpu.memory_space<vmem>>, vector<8x32xf32>
    %c0_i32_22 = arith.constant 0 : i32
    %c8_i32 = arith.constant 8 : i32
    %24 = arith.addi %c0_i32_22, %c8_i32 : i32
    %c1_i32 = arith.constant 1 : i32
    %25:2 = scf.for %arg15 = %c0_i32_22 to %24 step %c1_i32 iter_args(%arg16 = %22, %arg17 = %23) -> (vector<8x32xf32>, vector<8x32xf32>)  : i32 {
      %38 = arith.index_cast %arg15 : i32 to index
      %c0_39 = arith.constant 0 : index
      %c0_40 = arith.constant 0 : index
      %39 = vector.load %arg13[%38, %c0_39, %c0_40] : memref<8x8x128xf32, #tpu.memory_space<vmem>>, vector<1x8x128xf32>
      %40 = vector.shape_cast %39 : vector<1x8x128xf32> to vector<8x128xf32>
      %41 = arith.truncf %arg16 : vector<8x32xf32> to vector<8x32xbf16>
      %cst_41 = arith.constant dense<0.000000e+00> : vector<8x128xf32>
      %42 = tpu.matmul %41, %3, %cst_41 {dimension_numbers = #tpu.dot_dimension_numbers<[1], [0], [0], [1], [0, 0, 1, 1], [], []>} : vector<8x32xbf16>, vector<32x128xbf16>, vector<8x128xf32> -> vector<8x128xf32>
      %43 = arith.addf %40, %42 : vector<8x128xf32>
      %44 = vector.extract_strided_slice %43 {offsets = [0, 0], sizes = [8, 32], strides = [1, 1]} : vector<8x128xf32> to vector<8x32xf32>
      %cst_42 = arith.constant 5.000000e-01 : f32
      %45 = vector.broadcast %cst_42 : f32 to vector<8x32xf32>
      %46 = arith.mulf %45, %44 : vector<8x32xf32>
      %47 = math.tanh %46 : vector<8x32xf32>
      %cst_43 = arith.constant 5.000000e-01 : f32
      %48 = vector.broadcast %cst_43 : f32 to vector<8x32xf32>
      %49 = arith.mulf %48, %47 : vector<8x32xf32>
      %cst_44 = arith.constant 5.000000e-01 : f32
      %50 = vector.broadcast %cst_44 : f32 to vector<8x32xf32>
      %51 = arith.addf %49, %50 : vector<8x32xf32>
      %52 = vector.extract_strided_slice %43 {offsets = [0, 32], sizes = [8, 32], strides = [1, 1]} : vector<8x128xf32> to vector<8x32xf32>
      %cst_45 = arith.constant 5.000000e-01 : f32
      %53 = vector.broadcast %cst_45 : f32 to vector<8x32xf32>
      %54 = arith.mulf %53, %52 : vector<8x32xf32>
      %55 = math.tanh %54 : vector<8x32xf32>
      %cst_46 = arith.constant 5.000000e-01 : f32
      %56 = vector.broadcast %cst_46 : f32 to vector<8x32xf32>
      %57 = arith.mulf %56, %55 : vector<8x32xf32>
      %cst_47 = arith.constant 5.000000e-01 : f32
      %58 = vector.broadcast %cst_47 : f32 to vector<8x32xf32>
      %59 = arith.addf %57, %58 : vector<8x32xf32>
      %60 = vector.extract_strided_slice %43 {offsets = [0, 64], sizes = [8, 32], strides = [1, 1]} : vector<8x128xf32> to vector<8x32xf32>
      %61 = math.tanh %60 : vector<8x32xf32>
      %62 = vector.extract_strided_slice %43 {offsets = [0, 96], sizes = [8, 32], strides = [1, 1]} : vector<8x128xf32> to vector<8x32xf32>
      %cst_48 = arith.constant 5.000000e-01 : f32
      %63 = vector.broadcast %cst_48 : f32 to vector<8x32xf32>
      %64 = arith.mulf %63, %62 : vector<8x32xf32>
      %65 = math.tanh %64 : vector<8x32xf32>
      %cst_49 = arith.constant 5.000000e-01 : f32
      %66 = vector.broadcast %cst_49 : f32 to vector<8x32xf32>
      %67 = arith.mulf %66, %65 : vector<8x32xf32>
      %cst_50 = arith.constant 5.000000e-01 : f32
      %68 = vector.broadcast %cst_50 : f32 to vector<8x32xf32>
      %69 = arith.addf %67, %68 : vector<8x32xf32>
      %70 = arith.mulf %59, %arg17 : vector<8x32xf32>
      %71 = arith.mulf %51, %61 : vector<8x32xf32>
      %72 = arith.addf %70, %71 : vector<8x32xf32>
      %73 = math.tanh %72 : vector<8x32xf32>
      %74 = arith.mulf %69, %73 : vector<8x32xf32>
      %75 = arith.index_cast %arg15 : i32 to index
      %c0_51 = arith.constant 0 : index
      %c0_52 = arith.constant 0 : index
      %76 = vector.load %arg14[%75, %c0_51, %c0_52] : memref<8x8x32xf32, #tpu.memory_space<vmem>>, vector<1x8x32xf32>
      %77 = vector.shape_cast %76 : vector<1x8x32xf32> to vector<8x32xf32>
      %78 = vector.shape_cast %74 : vector<8x32xf32> to vector<1x8x32xf32>
      tpu.vector_store %arg14[%75, %c0_51, %c0_52], %78 {strides = array<i32>} : memref<8x8x32xf32, #tpu.memory_space<vmem>>, vector<1x8x32xf32>,
      scf.yield %74, %72 : vector<8x32xf32>, vector<8x32xf32>
    }
    %c8_i32_23 = arith.constant 8 : i32
    %c0_24 = arith.constant 0 : index
    %c0_25 = arith.constant 0 : index
    %26 = vector.load %arg11[%c0_24, %c0_25] : memref<8x32xf32, #tpu.memory_space<vmem>>, vector<8x32xf32>
    tpu.vector_store %arg11[%c0_24, %c0_25], %25#0 {strides = array<i32>} : memref<8x32xf32, #tpu.memory_space<vmem>>, vector<8x32xf32>,
    %c0_26 = arith.constant 0 : index
    %c0_27 = arith.constant 0 : index
    %27 = vector.load %arg12[%c0_26, %c0_27] : memref<8x32xf32, #tpu.memory_space<vmem>>, vector<8x32xf32>
    tpu.vector_store %arg12[%c0_26, %c0_27], %25#1 {strides = array<i32>} : memref<8x32xf32, #tpu.memory_space<vmem>>, vector<8x32xf32>,
    %c0_28 = arith.constant 0 : index
    %c0_29 = arith.constant 0 : index
    %c0_30 = arith.constant 0 : index
    %28 = vector.load %arg14[%c0_28, %c0_29, %c0_30] : memref<8x8x32xf32, #tpu.memory_space<vmem>>, vector<8x8x32xf32>
    %29 = vector.shape_cast %28 : vector<8x8x32xf32> to vector<64x32xf32>
    %30 = arith.truncf %29 : vector<64x32xf32> to vector<64x32xbf16>
    %c0_31 = arith.constant 0 : index
    %c0_32 = arith.constant 0 : index
    %31 = vector.load %arg8[%c0_31, %c0_32] : memref<32x1xbf16, #tpu.memory_space<vmem>>, vector<32x1xbf16>
    %cst_33 = arith.constant dense<0.000000e+00> : vector<64x1xf32>
    %32 = tpu.matmul %30, %31, %cst_33 {dimension_numbers = #tpu.dot_dimension_numbers<[1], [0], [0], [1], [0, 0, 1, 1], [], []>} : vector<64x32xbf16>, vector<32x1xbf16>, vector<64x1xf32> -> vector<64x1xf32>
    %c0_34 = arith.constant 0 : index
    %c0_35 = arith.constant 0 : index
    %33 = vector.load %arg9[%c0_34, %c0_35] : memref<1x1xf32, #tpu.memory_space<vmem>>, vector<1x1xf32>
    %34 = vector.broadcast %33 : vector<1x1xf32> to vector<64x1xf32>
    %35 = arith.addf %32, %34 : vector<64x1xf32>
    %36 = vector.shape_cast %35 : vector<64x1xf32> to vector<8x8x1xf32>
    %c0_36 = arith.constant 0 : index
    %c0_37 = arith.constant 0 : index
    %c0_38 = arith.constant 0 : index
    %37 = vector.load %arg10[%c0_36, %c0_37, %c0_38] : memref<8x8x1xf32, #tpu.memory_space<vmem>>, vector<8x8x1xf32>
    tpu.vector_store %arg10[%c0_36, %c0_37, %c0_38], %36 {strides = array<i32>} : memref<8x8x1xf32, #tpu.memory_space<vmem>>, vector<8x8x1xf32>,
    return
  }
  func.func @transform_0(%arg0: i32, %arg1: i32) -> (i32, i32, i32) {
    %c0_i32 = arith.constant 0 : i32
    %c0_i32_0 = arith.constant 0 : i32
    return %arg1, %arg0, %c0_i32 : i32, i32, i32
  }
  func.func @transform_1(%arg0: i32, %arg1: i32) -> (i32, i32) {
    %c0_i32 = arith.constant 0 : i32
    %c0_i32_0 = arith.constant 0 : i32
    %c0_i32_1 = arith.constant 0 : i32
    return %c0_i32, %c0_i32_0 : i32, i32
  }
  func.func @transform_2(%arg0: i32, %arg1: i32) -> (i32, i32) {
    %c0_i32 = arith.constant 0 : i32
    %c0_i32_0 = arith.constant 0 : i32
    %c0_i32_1 = arith.constant 0 : i32
    return %c0_i32, %c0_i32_0 : i32, i32
  }
  func.func @transform_3(%arg0: i32, %arg1: i32) -> (i32, i32) {
    %c0_i32 = arith.constant 0 : i32
    %c0_i32_0 = arith.constant 0 : i32
    %c0_i32_1 = arith.constant 0 : i32
    return %c0_i32, %c0_i32_0 : i32, i32
  }
  func.func @transform_4(%arg0: i32, %arg1: i32) -> (i32, i32) {
    %c0_i32 = arith.constant 0 : i32
    %c0_i32_0 = arith.constant 0 : i32
    %c0_i32_1 = arith.constant 0 : i32
    return %c0_i32, %c0_i32_0 : i32, i32
  }
  func.func @transform_5(%arg0: i32, %arg1: i32) -> (i32, i32) {
    %c0_i32 = arith.constant 0 : i32
    %c0_i32_0 = arith.constant 0 : i32
    %c0_i32_1 = arith.constant 0 : i32
    return %c0_i32, %c0_i32_0 : i32, i32
  }
  func.func @transform_6(%arg0: i32, %arg1: i32) -> (i32, i32) {
    %c0_i32 = arith.constant 0 : i32
    %c0_i32_0 = arith.constant 0 : i32
    %c0_i32_1 = arith.constant 0 : i32
    return %c0_i32, %c0_i32_0 : i32, i32
  }
  func.func @transform_7(%arg0: i32, %arg1: i32) -> (i32, i32) {
    %c0_i32 = arith.constant 0 : i32
    %c0_i32_0 = arith.constant 0 : i32
    %c0_i32_1 = arith.constant 0 : i32
    return %c0_i32, %c0_i32_0 : i32, i32
  }
  func.func @transform_8(%arg0: i32, %arg1: i32) -> (i32, i32, i32) {
    %c0_i32 = arith.constant 0 : i32
    %c0_i32_0 = arith.constant 0 : i32
    return %arg1, %arg0, %c0_i32 : i32, i32, i32
  }
}

</mosaic_0001>

<bundles_post_ra>
// kernel: lstm_model_forward.1
= control target key start
LH: loop header
LB: loop body
LE: loop exit
PB: predicated region body
PF: predicated region fallthrough
CT: control target
= control target key end

     0   :  { %s914_s0 = inlined_call_operand.hbm [shape: f32[8,8,16], index: 0, kind: input, shape index: {}]   ;;  %s915_s1 = inlined_call_operand.vmem [shape: bf16[16,32], index: 1, kind: input, shape index: {}]   ;;  %s916_s2 = inlined_call_operand.vmem [shape: f32[1,32], index: 2, kind: input, shape index: {}]   ;;  %s917_s3 = inlined_call_operand.vmem [shape: bf16[32,128], index: 3, kind: input, shape index: {}]   ;;  %s918_s4 = inlined_call_operand.hbm [shape: bf16[32,128], index: 4, kind: input, shape index: {}]   ;;  %s919_s5 = inlined_call_operand.vmem [shape: f32[1,128], index: 5, kind: input, shape index: {}]   ;;  %s920_s6 = inlined_call_operand.vmem [shape: bf16[32,1], index: 6, kind: input, shape index: {}]   ;;  %s921_s7 = inlined_call_operand.<no memory space> [shape: f32[1,1], index: 7, kind: input, shape index: {}]   ;;  %s922_s8 = inlined_call_operand.vmem [shape: f32[8,8,1], index: 8, kind: output, shape index: {}]  }
   0x1   :  { %v13_v0 = vstv %s921_s7 }
   0x2   :  { %14 = vst [vmem:[#allocation6] sm:$0x1] %v13_v0 }
   0x3   :  { %15 = vsyncpa [#allocation8], 0 }
   0x4   :  { %16 = vsyncpa [#allocation10], 0  ;;  %s752_s29 = smov [#allocation7]  }
   0x5   :  { %s22_s30 = sshll.u32 %s752_s29, 4  ;;  %s23_s30 = int_to_ptr.vmem [resolvable:$true] %s22_s30 }
   0x6   :  { %s692_s9 = scalar_lea.vmem %s23_s30, 1024  ;;  %p697_p1 = scmp.lt.s32.totalorder %s23_s30, %s23_s30 }
   0x7   :  { %p693_p0 = scmp.ne.s32.totalorder %s23_s30, %s692_s9  ;;  %p698_p2 = scmp.lt.s32.totalorder %s692_s9, %s692_s9 }
   0x9   :  { %p699_p3 = por %p698_p2, %p697_p1 }
   0xb   :  { %p700_p4 = pnand %p699_p3, %p693_p0 }
   0xd   :  { %703 = shalt.err (!%p700_p4)
}
   0xe   :  { %s753_s10 = smov 128   ;;  %s754_s11 = smov 8  }
   0xf   :  { %28 = dma.hbm_to_vmem [thread:$0]  %s914_s0, 1024, %s23_s30, [#allocation8], %s753_s10, %s753_s10, %s754_s11  }
  0x10   :  { %s755_s7 = smov [#allocation9]  }
  0x11   :  { %s40_s14 = sshll.u32 %s755_s7, 4  ;;  %s41_s14 = int_to_ptr.vmem [resolvable:$true] %s40_s14 }
  0x12   :  { %s712_s15 = scalar_lea.vmem %s41_s14, 256  ;;  %p717_p6 = scmp.lt.s32.totalorder %s41_s14, %s41_s14 }
  0x13   :  { %p713_p5 = scmp.ne.s32.totalorder %s41_s14, %s712_s15  ;;  %p718_p7 = scmp.lt.s32.totalorder %s712_s15, %s712_s15 }
  0x15   :  { %p719_p8 = por %p718_p7, %p717_p6 }
  0x17   :  { %p720_p9 = pnand %p719_p8, %p713_p5 }
  0x19   :  { %723 = shalt.err (!%p720_p9)
}
  0x1a   :  { %s756_s16 = smov 64   ;;  %s757_s17 = smov 4  }
  0x1b   :  { %46 = dma.hbm_to_vmem [thread:$0]  %s918_s4, 256, %s41_s14, [#allocation10], %s756_s16, %s756_s16, %s757_s17  }
  0x1c   :  { %736 = dma.done.wait [#allocation8], 1024  }
  0x1d   :  { %737 = vsyncadd [#allocation8], 4294966272 }
  0x1e   :  { %738 = dma.done.wait [#allocation10], 256  }
  0x1f   :  { %739 = vsyncadd [#allocation10], 4294967040  ;;  %v818_v1 = vld [vmem:[#allocation9] sm:$0xf]  ;;  %v820_v2 = vld [vmem:[#allocation9 + $0x4] sm:$0xf] }
  0x20   :  { %v822_v3 = vld [vmem:[#allocation9 + $0x8] sm:$0xf]  ;;  %v824_v4 = vld [vmem:[#allocation9 + $0xc] sm:$0xf]  ;;  %v72_v6 = vld [vmem:[#allocation7] sm:$0xff]  ;;  %vm99_vm0 = vcmask 130048  }
  0x21   :  { %v673_v5 = vld [vmem:[%s915_s1] sm:$0xff]   ;;  %v75_v10 = vld [vmem:[#allocation7 + $0x18] sm:$0xff]  ;;  %v76_v11 = vld [vmem:[#allocation7 + $0x20] sm:$0xff]  ;;  %vm64_vm1 = vcmask 261120   ;;  %v758_v20 = vmov 0.0  }
  0x22   :  { %v73_v7 = vld [vmem:[#allocation7 + $0x8] sm:$0xff]  ;;  %v74_v9 = vld [vmem:[#allocation7 + $0x10] sm:$0xff]  ;;  %591 = vmatprep.subr.bf16.mxu0 %v673_v5  ;;  %v79_v16 = vld [vmem:[#allocation7 + $0x38] sm:$0xff]  ;;  %65 = vst.msk [vmem:[#allocation2] sm:$0xff] %vm64_vm1, %v758_v20 }
  0x23   :  { %v80_v8 = vpack.c.bf16 %v73_v7, %v72_v6  ;;  %v81_v12 = vpack.c.bf16 %v75_v10, %v74_v9  ;;  %v77_v13 = vld [vmem:[#allocation7 + $0x28] sm:$0xff]  ;;  %592 = vmatpush3.bf16.msra.mxu0 %v673_v5  ;;  %v78_v15 = vld [vmem:[#allocation7 + $0x30] sm:$0xff]  ;;  %66 = vst.msk [vmem:[#allocation3] sm:$0xff] %vm64_vm1, %v758_v20 }
  0x24   :  { %v82_v14 = vpack.c.bf16 %v77_v13, %v76_v11  ;;  %v83_v17 = vpack.c.bf16 %v79_v16, %v78_v15  ;;  %v674_v18 = vld [vmem:[%s917_s3 + $0x8] sm:$0xff]   ;;  %v675_v19 = vld [vmem:[%s917_s3] sm:$0xff]  }
  0x25   :  { %593 = vmatprep.mubr.msk.bf16.mxu0 %vm99_vm0, %v80_v8  ;;  %601 = vmatprep.subr.bf16.mxu1 %v674_v18  ;;  %v547_v25 = vld [vmem:[%s916_s2] ss:$0 sm:$0xff] }
  0x26   :  { %594 = vmatmul.mubr.msk.bf16.vlgmr.msra.gmra.mxu0 %vm99_vm0, %v81_v12  ;;  %602 = vmatpush3.bf16.msra.mxu1 %v674_v18  ;;  %v553_v52 = vld [vmem:[%s919_s5] ss:$0 sm:$0xff]  ;;  %s851_s5 = smov 0  }
  0x27   :  { %597 = vmatprep.mubr.msk.bf16.mxu0 %vm99_vm0, %v82_v14  ;;  %603 = vmatprep.subr.bf16.mxu1 %v675_v19 }
  0x29   :  { %v297_v21 = vld [vmem:[#allocation2] sm:$0xff]  }
  0x2a   :  { %604 = vmatpush3.bf16.msra.mxu1 %v675_v19  ;;  %v298_v22 = vld [vmem:[#allocation3] sm:$0xff]   ;;  %v744_v10 = vmov %v297_v21  }
  0x2b   :  { %v740_v9 = vmov %v298_v22  }
  0x2e   :  { %598 = vmatmul.mubr.msk.bf16.gmra.mxu0 %vm99_vm0, %v83_v17 }
  0xe6   :  { %v595_v23 = vpop.f32.mrf.mxu0 }
  0xe7   :  { %v155_v29 = vadd.f32 %v595_v23, %v547_v25 }
  0xe8   :  { %v146_v24 = vpop.f32.mrf.mxu0 }
  0xe9   :  { %v147_v27 = vadd.f32 %v547_v25, %v146_v24  ;;  %v179_v36 = vmax.f32 %v155_v29, 0.0 }
  0xea   :  { %v596_v26 = vpop.f32.mrf.mxu0 }
  0xeb   :  { %v158_v28 = vadd.f32 %v596_v26, %v547_v25  ;;  %v177_v34 = vmax.f32 %v147_v27, 0.0 }
  0xec   :  { %v149_v30 = vpop.f32.mrf.mxu0 }
  0xed   :  { %v150_v31 = vadd.f32 %v547_v25, %v149_v30  ;;  %v180_v32 = vmax.f32 %v158_v28, 0.0 }
  0xee   :  { %v599_v33 = vpop.f32.mrf.mxu0 }
  0xef   :  { %v178_v35 = vmax.f32 %v150_v31, 0.0  ;;  %v186_v39 = vpack.c.bf16 %v180_v32, %v179_v36  ;;  %v171_v43 = vadd.f32 %v599_v33, %v547_v25 }
  0xf0   :  { %v162_v37 = vpop.f32.mrf.mxu0 }
  0xf1   :  { %v185_v38 = vpack.c.bf16 %v178_v35, %v177_v34  ;;  %v163_v41 = vadd.f32 %v547_v25, %v162_v37  ;;  %v183_v49 = vmax.f32 %v171_v43, 0.0 }
  0xf2   :  { %v600_v40 = vpop.f32.mrf.mxu0 }
  0xf3   :  { %v174_v42 = vadd.f32 %v600_v40, %v547_v25  ;;  %605 = vmatprep.mubr.msk.bf16.mxu1 %vm64_vm1, %v185_v38  ;;  %v181_v47 = vmax.f32 %v163_v41, 0.0 }
  0xf4   :  { %v165_v44 = vpop.f32.mrf.mxu0  ;;  %606 = vmatmul.mubr.msk.bf16.vlgmr.msra.gmra.mxu1 %vm64_vm1, %v186_v39 }
  0xf5   :  { %v166_v45 = vadd.f32 %v547_v25, %v165_v44  ;;  %v184_v46 = vmax.f32 %v174_v42, 0.0 }
  0xf7   :  { %v182_v48 = vmax.f32 %v166_v45, 0.0  ;;  %v188_v51 = vpack.c.bf16 %v184_v46, %v183_v49 }
  0xf9   :  { %v187_v50 = vpack.c.bf16 %v182_v48, %v181_v47 }
  0xfb   :  { %609 = vmatprep.mubr.msk.bf16.mxu1 %vm64_vm1, %v187_v50 }
  0xfc   :  { %610 = vmatmul.mubr.msk.bf16.gmra.mxu1 %vm64_vm1, %v188_v51 }
 0x1b4   :  { %v607_v53 = vpop.f32.mrf.mxu1 }
 0x1b5   :  { %v267_v54 = vadd.f32 %v607_v53, %v553_v52 }
 0x1b6   :  { %v258_v55 = vpop.f32.mrf.mxu1 }
 0x1b7   :  { %291 = vst [vmem:[#allocation4 + $0x10] sm:$0xff] %v267_v54  ;;  %v259_v56 = vadd.f32 %v553_v52, %v258_v55 }
 0x1b8   :  { %v608_v57 = vpop.f32.mrf.mxu1 }
 0x1b9   :  { %289 = vst [vmem:[#allocation4] sm:$0xff] %v259_v56  ;;  %v270_v58 = vadd.f32 %v608_v57, %v553_v52 }
 0x1ba   :  { %v261_v59 = vpop.f32.mrf.mxu1 }
 0x1bb   :  { %292 = vst [vmem:[#allocation4 + $0x18] sm:$0xff] %v270_v58  ;;  %v262_v60 = vadd.f32 %v553_v52, %v261_v59 }
 0x1bc   :  { %v611_v61 = vpop.f32.mrf.mxu1 }
 0x1bd   :  { %290 = vst [vmem:[#allocation4 + $0x8] sm:$0xff] %v262_v60  ;;  %v283_v62 = vadd.f32 %v611_v61, %v553_v52 }
 0x1be   :  { %v274_v63 = vpop.f32.mrf.mxu1 }
 0x1bf   :  { %295 = vst [vmem:[#allocation4 + $0x30] sm:$0xff] %v283_v62  ;;  %v275_v0 = vadd.f32 %v553_v52, %v274_v63 }
 0x1c0   :  { %v612_v5 = vpop.f32.mrf.mxu1 }
 0x1c1   :  { %293 = vst [vmem:[#allocation4 + $0x20] sm:$0xff] %v275_v0  ;;  %v286_v6 = vadd.f32 %v612_v5, %v553_v52 }
 0x1c2   :  { %v277_v7 = vpop.f32.mrf.mxu1 }
 0x1c3   :  { %296 = vst [vmem:[#allocation4 + $0x38] sm:$0xff] %v286_v6  ;;  %v278_v8 = vadd.f32 %v553_v52, %v277_v7 }
 0x1c5   :  { %294 = vst [vmem:[#allocation4 + $0x28] sm:$0xff] %v278_v8 }
 0x1c6 LB: > { %v562_v11 = vcombine.low %v822_v3, %v824_v4  ;;  %v759_v12 = vmov 0.0   ;;  %vm760_vm2 = vmmov 0   ;;  %v561_v13 = vcombine.low %v818_v1, %v820_v2  ;;  %s560_s25 = sshll.u32 %s750_s5, 3  ;;  %s761_s27 = smov 64   ;;  %s750_s5 = sphi %s851_s5, %s304_s5   ;;  %v746_v10 = vphi %v744_v10, %v745_v10   ;;  %v742_v9 = vphi %v740_v9, %v741_v9  }
 0x1c7   : > { %613 = vmatprep.subr.bf16.mxu0 %v759_v12  ;;  %617 = vmatprep.mubr.msk.bf16.mxu0 %vm760_vm2, %v759_v12  ;;  %v310_v14 = vpack.c.bf16 %v746_v10, %v746_v10  ;;  %s308_s26 = scalar_lea.vmem [#allocation4], %s560_s25  ;;  %s762_s28 = smov 32  }
 0x1c8   : > { %614 = vmatpush3.bf16.msra.mxu0 %v562_v11  ;;  %s763_s29 = smov 96   ;;  %s397_s30 = scalar_lea.vmem [#allocation5], %s560_s25 }
 0x1c9   : > { %615 = vmatprep.subr.bf16.mxu0 %v759_v12  ;;  %s304_s5 = sadd.s32 1, %s750_s5  }
 0x1ca   : > { %p301_p10 = scmp.ge.s32.totalorder %s304_s5, 8  }
 0x1cb   :  { %v682_v37 = vld [vmem:[%s920_s6 + $0x8] sm:$0xff] (%p301_p10)   ;;  %v683_v38 = vld [vmem:[%s920_s6] sm:$0xff] (%p301_p10)   ;;  %v564_v47 = vld [vmem:[#allocation6] ss:$0 sm:$0xff] (%p301_p10)  ;;  %vm517_vm3 = vcmask (%p301_p10), 7168  }
 0x1cc   : > { %616 = vmatpush3.bf16.msra.mxu0 %v561_v13  ;;  %v309_v15 = vld [vmem:[%s308_s26] sm:$0xff]  ;;  %633 = vmatprep.subr.bf16.mxu1 (%p301_p10), %v682_v37 }
 0x1cd   :  { %621 = vmatprep.subr.bf16.mxu0 (%p301_p10), %v682_v37  ;;  %635 = vmatpush3.bf16.msra.mxu1 (%p301_p10), %v682_v37 }
 0x1ce   :  { %634 = vmatprep.subr.bf16.mxu1 (%p301_p10), %v683_v38 }
 0x1cf   : > { %618 = vmatmul.mubr.msk.bf16.vlgmr.msra.gmra.mxu0 %vm64_vm1, %v310_v14 }
 0x1d0   :  { %622 = vmatpush3.bf16.msra.mxu0 (%p301_p10), %v682_v37 }
 0x1d1   :  { %623 = vmatprep.subr.bf16.mxu0 (%p301_p10), %v683_v38  ;;  %636 = vmatpush3.bf16.msra.mxu1 (%p301_p10), %v683_v38 }
 0x1d4   :  { %624 = vmatpush3.bf16.msra.mxu0 (%p301_p10), %v683_v38 }
 0x28f   : > { %v360_v16 = vpop.f32.mrf.mxu0 }
 0x290   : > { %v366_v17 = vadd.f32 %v360_v16, %v309_v15 }
 0x291   : > { %v619_v18 = vpop.f32.mrf.mxu0 }
 0x292   : > { %676 = vtanh.f32 %v366_v17  ;;  %v367_v22 = vmul.f32 0.5, %v366_v17 }
 0x293   : > { %v363_v19 = vpop.f32.mrf.mxu0 }
 0x294   : > { %678 = vtanh.f32 %v367_v22 }
 0x295   : > { %v620_v20 = vpop.f32.mrf.mxu0 }
 0x29f   : > { %v677_v21 = vpop.eup %676 }
 0x2a0   : > { %378 = vrot.lane.b32.xlu0 %v677_v21, %s761_s27 }
 0x2a1   : > { %v679_v23 = vpop.eup %678 }
 0x2a2   : > { %v369_v24 = vmul.f32 0.5, %v679_v23 }
 0x2a4   : > { %373 = vrot.lane.b32.xlu0 %v742_v9, %s762_s28  ;;  %v370_v25 = vadd.f32 0.5, %v369_v24 }
 0x312   : > { %v379_v26 = vpop.permute.xlu0 %378 }
 0x313   : > { %v381_v27 = vmul.f32 %v379_v26, %v370_v25 }
 0x315   : > { %383 = vrot.lane.b32.xlu1 %v381_v27, %s762_s28 }
 0x316   : > { %v374_v28 = vpop.permute.xlu0 %373 }
 0x317   : > { %v376_v29 = vmul.f32 %v374_v28, %v370_v25 }
 0x387   : > { %v384_v30 = vpop.permute.xlu1 %383 }
 0x388   : > { %v386_v31 = vadd.f32 %v384_v30, %v376_v29 }
 0x38a   : > { %680 = vtanh.f32 %v386_v31 }
 0x397   : > { %v681_v32 = vpop.eup %680 }
 0x398   : > { %389 = vrot.lane.b32.xlu1 %v681_v32, %s761_s27 }
 0x39c   : > { %400 = vrot.lane.b32.xlu1 %v386_v31, %s763_s29 }
 0x40a   : > { %v390_v33 = vpop.permute.xlu1 %389 }
 0x40b   : > { %v392_v34 = vmul.f32 %v390_v33, %v370_v25 }
 0x40d   : > { %394 = vrot.lane.b32.xlu0 %v392_v34, %s762_s28 }
 0x40e   : > { %v401_v35 = vpop.permute.xlu1 %400  }
 0x40f   : > { %v741_v9 = vmov %v401_v35   ;;  %404 = vst.msk [vmem:[#allocation3] sm:$0xff] (%p301_p10), %vm64_vm1, %v401_v35 }
 0x47c   :  { %303 = sbr.rel (!%p301_p10) target bundleno = 454 (0x1c6), region = 73 }
 0x47f   : > { %v395_v36 = vpop.permute.xlu0 %394  }
 0x480   : > { %398 = vst.msk [vmem:[%s397_s30] sm:$0xff] %vm64_vm1, %v395_v36  ;;  %v745_v10 = vmov %v395_v36   ;;  %403 = vst.msk [vmem:[#allocation2] sm:$0xff] (%p301_p10), %vm64_vm1, %v395_v36 }
 0x487   :  { %v405_v39 = vld [vmem:[#allocation5] sm:$0xff]  ;;  %v406_v40 = vld [vmem:[#allocation5 + $0x8] sm:$0xff]  ;;  %v407_v2 = vld [vmem:[#allocation5 + $0x10] sm:$0xff] }
 0x488   :  { %v409_v41 = vld [vmem:[#allocation5 + $0x20] sm:$0xff]  ;;  %v413_v42 = vpack.c.bf16 %v406_v40, %v405_v39  ;;  %v410_v1 = vld [vmem:[#allocation5 + $0x28] sm:$0xff]  ;;  %v408_v3 = vld [vmem:[#allocation5 + $0x18] sm:$0xff] }
 0x489   :  { %v415_v4 = vpack.c.bf16 %v410_v1, %v409_v41  ;;  %v411_v43 = vld [vmem:[#allocation5 + $0x30] sm:$0xff]  ;;  %v412_v44 = vld [vmem:[#allocation5 + $0x38] sm:$0xff]  ;;  %v414_v45 = vpack.c.bf16 %v408_v3, %v407_v2 }
 0x48a   :  { %625 = vmatprep.mubr.msk.bf16.mxu0 %vm64_vm1, %v413_v42  ;;  %v416_v46 = vpack.c.bf16 %v412_v44, %v411_v43 }
 0x48b   :  { %629 = vmatprep.mubr.msk.bf16.mxu1 %vm64_vm1, %v415_v4  ;;  %626 = vmatmul.mubr.msk.bf16.vlgmr.msra.gmra.mxu0 %vm64_vm1, %v414_v45 }
 0x48c   :  { %630 = vmatmul.mubr.msk.bf16.vlgmr.msra.gmra.mxu1 %vm64_vm1, %v416_v46 }
 0x54b   :  { %v627_v48 = vpop.f32.mrf.mxu0 }
 0x54c   :  { %v631_v49 = vpop.f32.mrf.mxu1  ;;  %v495_v50 = vadd.f32 %v627_v48, %v564_v47 }
 0x54d   :  { %v511_v51 = vadd.f32 %v631_v49, %v564_v47  ;;  %v486_v52 = vpop.f32.mrf.mxu0 }
 0x54e   :  { %v502_v53 = vpop.f32.mrf.mxu1  ;;  %520 = vst.msk [vmem:[%s922_s8 + $0x10] sm:$0xff] %vm517_vm3, %v495_v50  ;;  %v487_v54 = vadd.f32 %v564_v47, %v486_v52 }
 0x54f   :  { %524 = vst.msk [vmem:[%s922_s8 + $0x30] sm:$0xff] %vm517_vm3, %v511_v51  ;;  %v503_v55 = vadd.f32 %v564_v47, %v502_v53  ;;  %v628_v56 = vpop.f32.mrf.mxu0 }
 0x550   :  { %v632_v57 = vpop.f32.mrf.mxu1  ;;  %518 = vst.msk [vmem:[%s922_s8] sm:$0xff] %vm517_vm3, %v487_v54  ;;  %v498_v58 = vadd.f32 %v628_v56, %v564_v47 }
 0x551   :  { %522 = vst.msk [vmem:[%s922_s8 + $0x20] sm:$0xff] %vm517_vm3, %v503_v55  ;;  %v514_v59 = vadd.f32 %v632_v57, %v564_v47  ;;  %v489_v60 = vpop.f32.mrf.mxu0 }
 0x552   :  { %v505_v61 = vpop.f32.mrf.mxu1  ;;  %521 = vst.msk [vmem:[%s922_s8 + $0x18] sm:$0xff] %vm517_vm3, %v498_v58  ;;  %v490_v62 = vadd.f32 %v564_v47, %v489_v60 }
 0x553   :  { %525 = vst.msk [vmem:[%s922_s8 + $0x38] sm:$0xff] %vm517_vm3, %v514_v59  ;;  %v506_v63 = vadd.f32 %v564_v47, %v505_v61 }
 0x554   :  { %519 = vst.msk [vmem:[%s922_s8 + $0x8] sm:$0xff] %vm517_vm3, %v490_v62 }
 0x555   :  { %523 = vst.msk [vmem:[%s922_s8 + $0x28] sm:$0xff] %vm517_vm3, %v506_v63 }
 0x556   :  { %530 = vsyncpa [#allocation8], 1 }
 0x557   :  { %531 = vsyncpa [#allocation10], 1 }

</bundles_post_ra>
